<compile_context>
chip_gen: v7x
topology: tpu7x:2x2x1
jax: 0.10.0
libtpu: 0.0.40
codegen_flags: <defaults>
</compile_context>

<pallas_src>
import math

import jax
import jax.numpy as jnp
from jax.experimental import pallas as pl
from jax.experimental.pallas import tpu as pltpu

# Model dims (from BasicLinearNet.__init__ with T=24, num_hidden_units=128)
T = 24
INPUT_SIZE = T * (4 + 4 + 1) + 7 + 12 + 31 + 7 + 24 + 3   # = 300
HIDDEN = 128
OUTPUT_SIZE = 24

K_PAD = 384      # layer-1 contraction dim padded to 3 full 128-lane tiles
OUT_PAD = 128    # lane-dense output width; sliced back to 24 in the wrapper


def _round_up(n, m):
    return ((n + m - 1) // m) * m


def mlp_kernel(x_ref, w1_ref, b1_ref, w2_ref, b2_ref, w3_ref, b3_ref, o_ref):
    mm_dtype = w1_ref.dtype   # bf16 (default) or f32 matmul-input dtype
    # layer1 + ReLU : MXU matmul with f32 accumulate; bias + max on VPU in f32
    h = jnp.dot(x_ref[...], w1_ref[...], preferred_element_type=jnp.float32)
    h = jnp.maximum(h + b1_ref[...], 0.0)
    # layer2 + ReLU
    h = jnp.dot(h.astype(mm_dtype), w2_ref[...],
                preferred_element_type=jnp.float32)
    h = jnp.maximum(h + b2_ref[...], 0.0)
    # output layer (padded to 128 lanes -> unmasked stores; no activation)
    out = jnp.dot(h.astype(mm_dtype), w3_ref[...],
                  preferred_element_type=jnp.float32)
    o_ref[...] = (out + b3_ref[...]).astype(o_ref.dtype)


def basic_linear_net(x, params, *, batch_tile=256, use_bf16_matmul=True):
    """x: [B, INPUT_SIZE] float32 -> [B, OUTPUT_SIZE] float32."""
    w1, b1, w2, b2, w3, b3 = params
    B = x.shape[0]

    # ---- choose batch tile / grid ------------------------------------------
    B_aligned = _round_up(B, 8)
    bt = min(batch_tile, B_aligned)
    # Keep >= 2 grid steps when possible: the "parallel" batch axis is what
    # shards work across v7x's 2 TensorCores (free on v5e/v6e).
    if B_aligned // bt < 2 and B_aligned >= 16:
        bt = _round_up((B_aligned + 1) // 2, 8)
    B_pad = _round_up(B_aligned, bt)
    grid = (B_pad // bt,)

    # ---- pad & cast operands (outside the kernel, once per call) -----------
    mm_dtype = jnp.bfloat16 if use_bf16_matmul else jnp.float32
    xp = jnp.pad(x, ((0, B_pad - B), (0, K_PAD - INPUT_SIZE))).astype(mm_dtype)
    w1p = jnp.pad(w1, ((0, K_PAD - INPUT_SIZE), (0, 0))).astype(mm_dtype)
    w2p = w2.astype(mm_dtype)
    w3p = jnp.pad(w3, ((0, 0), (0, OUT_PAD - OUTPUT_SIZE))).astype(mm_dtype)
    b1p = b1.astype(jnp.float32)
    b2p = b2.astype(jnp.float32)
    b3p = jnp.pad(b3, ((0, 0), (0, OUT_PAD - OUTPUT_SIZE))).astype(jnp.float32)

    full = lambda arr: pl.BlockSpec(arr.shape, lambda i: (0, 0))

    out = pl.pallas_call(
        mlp_kernel,
        out_shape=jax.ShapeDtypeStruct((B_pad, OUT_PAD), jnp.float32),
        grid_spec=pltpu.PrefetchScalarGridSpec(
            num_scalar_prefetch=0,
            grid=grid,
            in_specs=[
                pl.BlockSpec((bt, K_PAD), lambda i: (i, 0)),   # x batch tile
                full(w1p), full(b1p),
                full(w2p), full(b2p),
                full(w3p), full(b3p),
            ],
            out_specs=pl.BlockSpec((bt, OUT_PAD), lambda i: (i, 0)),
        ),
        compiler_params=pltpu.CompilerParams(
            dimension_semantics=("parallel",),
        ),
    )(xp, w1p, b1p, w2p, b2p, w3p, b3p)

    # Drop padded batch rows and padded output lanes.
    return out[:B, :OUTPUT_SIZE]


def init_params(key):
    """Deterministic init mimicking PyTorch Linear default:
    U(-1/sqrt(fan_in), 1/sqrt(fan_in)). Weights stored as [in, out]."""
    def linear(key, fan_in, fan_out):
        kw, kb = jax.random.split(key)
        bound = 1.0 / math.sqrt(fan_in)
        w = jax.random.uniform(kw, (fan_in, fan_out), jnp.float32, -bound, bound)
        b = jax.random.uniform(kb, (1, fan_out), jnp.float32, -bound, bound)
        return w, b

    k1, k2, k3 = jax.random.split(key, 3)
    w1, b1 = linear(k1, INPUT_SIZE, HIDDEN)
    w2, b2 = linear(k2, HIDDEN, HIDDEN)
    w3, b3 = linear(k3, HIDDEN, OUTPUT_SIZE)
    return (w1, b1, w2, b2, w3, b3)


def reference(x, params):
    w1, b1, w2, b2, w3, b3 = params
    h = jnp.maximum(x @ w1 + b1, 0.0)
    h = jnp.maximum(h @ w2 + b2, 0.0)
    return h @ w3 + b3


if __name__ == "__main__":
    key = jax.random.PRNGKey(0)
    kp, kx = jax.random.split(key)
    params = init_params(kp)

    # Small, non-tile-aligned batch to exercise the padding + slicing path and
    # the multi-step parallel grid.
    batch = 13
    x = jax.random.normal(kx, (batch, INPUT_SIZE), jnp.float32)

    out = basic_linear_net(x, params)          # bf16 MXU inputs, f32 accumulate
    out = jax.block_until_ready(out)

    ref = reference(x, params)                 # pure-f32 reference
    assert out.shape == (batch, OUTPUT_SIZE)
    # bf16 matmul inputs => relaxed tolerance vs. the f32 reference.
    assert jnp.allclose(out, ref, atol=5e-2, rtol=5e-2), (
        float(jnp.max(jnp.abs(out - ref))))

    print("KERNEL_OK")
</pallas_src>

<mosaic_0001>
module attributes {stable_mosaic.version = 11 : i64} {
  func.func @mlp_kernel(%arg0: i32, %arg1: memref<8x384xbf16, #tpu.memory_space<vmem>>, %arg2: memref<384x128xbf16, #tpu.memory_space<vmem>>, %arg3: memref<1x128xf32, #tpu.memory_space<vmem>>, %arg4: memref<128x128xbf16, #tpu.memory_space<vmem>>, %arg5: memref<1x128xf32, #tpu.memory_space<vmem>>, %arg6: memref<128x128xbf16, #tpu.memory_space<vmem>>, %arg7: memref<1x128xf32, #tpu.memory_space<vmem>>, %arg8: memref<8x128xf32, #tpu.memory_space<vmem>>) attributes {dimension_semantics = [#tpu.dimension_semantics<parallel>], iteration_bounds = array<i64: 2>, scalar_prefetch = 0 : i64, scratch_operands = 0 : i64, tpu.core_type = #tpu.core_type<tc>, window_params = [{transform_indices = @transform_0, window_bounds = array<i64: 8, 384>}, {pipeline_mode = #tpu.pipeline_mode<synchronous>, transform_indices = @transform_1, window_bounds = array<i64: 384, 128>}, {pipeline_mode = #tpu.pipeline_mode<synchronous>, transform_indices = @transform_2, window_bounds = array<i64: 1, 128>}, {pipeline_mode = #tpu.pipeline_mode<synchronous>, transform_indices = @transform_3, window_bounds = array<i64: 128, 128>}, {pipeline_mode = #tpu.pipeline_mode<synchronous>, transform_indices = @transform_4, window_bounds = array<i64: 1, 128>}, {pipeline_mode = #tpu.pipeline_mode<synchronous>, transform_indices = @transform_5, window_bounds = array<i64: 128, 128>}, {pipeline_mode = #tpu.pipeline_mode<synchronous>, transform_indices = @transform_6, window_bounds = array<i64: 1, 128>}, {transform_indices = @transform_7, window_bounds = array<i64: 8, 128>}]} {
    %c0 = arith.constant 0 : index
    %c0_0 = arith.constant 0 : index
    %0 = vector.load %arg1[%c0, %c0_0] : memref<8x384xbf16, #tpu.memory_space<vmem>>, vector<8x384xbf16>
    %c0_1 = arith.constant 0 : index
    %c0_2 = arith.constant 0 : index
    %1 = vector.load %arg2[%c0_1, %c0_2] : memref<384x128xbf16, #tpu.memory_space<vmem>>, vector<384x128xbf16>
    %cst = arith.constant dense<0.000000e+00> : vector<8x128xf32>
    %2 = tpu.matmul %0, %1, %cst {dimension_numbers = #tpu.dot_dimension_numbers<[1], [0], [0], [1], [0, 0, 1, 1], [], []>} : vector<8x384xbf16>, vector<384x128xbf16>, vector<8x128xf32> -> vector<8x128xf32>
    %c0_3 = arith.constant 0 : index
    %c0_4 = arith.constant 0 : index
    %3 = vector.load %arg3[%c0_3, %c0_4] : memref<1x128xf32, #tpu.memory_space<vmem>>, vector<1x128xf32>
    %4 = vector.broadcast %3 : vector<1x128xf32> to vector<8x128xf32>
    %5 = arith.addf %2, %4 : vector<8x128xf32>
    %cst_5 = arith.constant 0.000000e+00 : f32
    %6 = vector.broadcast %cst_5 : f32 to vector<8x128xf32>
    %7 = arith.maximumf %5, %6 : vector<8x128xf32>
    %8 = arith.truncf %7 : vector<8x128xf32> to vector<8x128xbf16>
    %c0_6 = arith.constant 0 : index
    %c0_7 = arith.constant 0 : index
    %9 = vector.load %arg4[%c0_6, %c0_7] : memref<128x128xbf16, #tpu.memory_space<vmem>>, vector<128x128xbf16>
    %cst_8 = arith.constant dense<0.000000e+00> : vector<8x128xf32>
    %10 = tpu.matmul %8, %9, %cst_8 {dimension_numbers = #tpu.dot_dimension_numbers<[1], [0], [0], [1], [0, 0, 1, 1], [], []>} : vector<8x128xbf16>, vector<128x128xbf16>, vector<8x128xf32> -> vector<8x128xf32>
    %c0_9 = arith.constant 0 : index
    %c0_10 = arith.constant 0 : index
    %11 = vector.load %arg5[%c0_9, %c0_10] : memref<1x128xf32, #tpu.memory_space<vmem>>, vector<1x128xf32>
    %12 = vector.broadcast %11 : vector<1x128xf32> to vector<8x128xf32>
    %13 = arith.addf %10, %12 : vector<8x128xf32>
    %cst_11 = arith.constant 0.000000e+00 : f32
    %14 = vector.broadcast %cst_11 : f32 to vector<8x128xf32>
    %15 = arith.maximumf %13, %14 : vector<8x128xf32>
    %16 = arith.truncf %15 : vector<8x128xf32> to vector<8x128xbf16>
    %c0_12 = arith.constant 0 : index
    %c0_13 = arith.constant 0 : index
    %17 = vector.load %arg6[%c0_12, %c0_13] : memref<128x128xbf16, #tpu.memory_space<vmem>>, vector<128x128xbf16>
    %cst_14 = arith.constant dense<0.000000e+00> : vector<8x128xf32>
    %18 = tpu.matmul %16, %17, %cst_14 {dimension_numbers = #tpu.dot_dimension_numbers<[1], [0], [0], [1], [0, 0, 1, 1], [], []>} : vector<8x128xbf16>, vector<128x128xbf16>, vector<8x128xf32> -> vector<8x128xf32>
    %c0_15 = arith.constant 0 : index
    %c0_16 = arith.constant 0 : index
    %19 = vector.load %arg7[%c0_15, %c0_16] : memref<1x128xf32, #tpu.memory_space<vmem>>, vector<1x128xf32>
    %20 = vector.broadcast %19 : vector<1x128xf32> to vector<8x128xf32>
    %21 = arith.addf %18, %20 : vector<8x128xf32>
    %c0_17 = arith.constant 0 : index
    %c0_18 = arith.constant 0 : index
    %22 = vector.load %arg8[%c0_17, %c0_18] : memref<8x128xf32, #tpu.memory_space<vmem>>, vector<8x128xf32>
    tpu.vector_store %arg8[%c0_17, %c0_18], %21 {strides = array<i32>} : memref<8x128xf32, #tpu.memory_space<vmem>>, vector<8x128xf32>,
    return
  }
  func.func @transform_0(%arg0: i32) -> (i32, i32) {
    %c0_i32 = arith.constant 0 : i32
    %c0_i32_0 = arith.constant 0 : i32
    return %arg0, %c0_i32 : i32, i32
  }
  func.func @transform_1(%arg0: i32) -> (i32, i32) {
    %c0_i32 = arith.constant 0 : i32
    %c0_i32_0 = arith.constant 0 : i32
    %c0_i32_1 = arith.constant 0 : i32
    return %c0_i32, %c0_i32_0 : i32, i32
  }
  func.func @transform_2(%arg0: i32) -> (i32, i32) {
    %c0_i32 = arith.constant 0 : i32
    %c0_i32_0 = arith.constant 0 : i32
    %c0_i32_1 = arith.constant 0 : i32
    return %c0_i32, %c0_i32_0 : i32, i32
  }
  func.func @transform_3(%arg0: i32) -> (i32, i32) {
    %c0_i32 = arith.constant 0 : i32
    %c0_i32_0 = arith.constant 0 : i32
    %c0_i32_1 = arith.constant 0 : i32
    return %c0_i32, %c0_i32_0 : i32, i32
  }
  func.func @transform_4(%arg0: i32) -> (i32, i32) {
    %c0_i32 = arith.constant 0 : i32
    %c0_i32_0 = arith.constant 0 : i32
    %c0_i32_1 = arith.constant 0 : i32
    return %c0_i32, %c0_i32_0 : i32, i32
  }
  func.func @transform_5(%arg0: i32) -> (i32, i32) {
    %c0_i32 = arith.constant 0 : i32
    %c0_i32_0 = arith.constant 0 : i32
    %c0_i32_1 = arith.constant 0 : i32
    return %c0_i32, %c0_i32_0 : i32, i32
  }
  func.func @transform_6(%arg0: i32) -> (i32, i32) {
    %c0_i32 = arith.constant 0 : i32
    %c0_i32_0 = arith.constant 0 : i32
    %c0_i32_1 = arith.constant 0 : i32
    return %c0_i32, %c0_i32_0 : i32, i32
  }
  func.func @transform_7(%arg0: i32) -> (i32, i32) {
    %c0_i32 = arith.constant 0 : i32
    %c0_i32_0 = arith.constant 0 : i32
    return %arg0, %c0_i32 : i32, i32
  }
}

</mosaic_0001>

<bundles_post_ra>
// kernel: tpu_custom_call.1
= control target key start
LH: loop header
LB: loop body
LE: loop exit
PB: predicated region body
PF: predicated region fallthrough
CT: control target
= control target key end

     0   :  { %12 = vsyncpa [#allocation3], 0  ;;  %s1816_s0 = inlined_call_operand.hbm [shape: bf16[16,384], index: 0, kind: input, shape index: {}]   ;;  %s1817_s1 = inlined_call_operand.hbm [shape: bf16[384,128], index: 1, kind: input, shape index: {}]   ;;  %s1818_s2 = inlined_call_operand.vmem [shape: f32[1,128], index: 2, kind: input, shape index: {}]   ;;  %s1819_s3 = inlined_call_operand.hbm [shape: bf16[128,128], index: 3, kind: input, shape index: {}]   ;;  %s1820_s4 = inlined_call_operand.vmem [shape: f32[1,128], index: 4, kind: input, shape index: {}]   ;;  %s1821_s5 = inlined_call_operand.hbm [shape: bf16[128,128], index: 5, kind: input, shape index: {}]   ;;  %s1822_s6 = inlined_call_operand.vmem [shape: f32[1,128], index: 6, kind: input, shape index: {}]   ;;  %s1823_s7 = inlined_call_operand.hbm [shape: f32[16,128], index: 7, kind: output, shape index: {}]  }
   0x1   :  { %14 = vsyncpa [#allocation3 + $0x1], 0 }
   0x2   :  { %15 = vsyncpa [#allocation6], 0 }
   0x3   :  { %16 = vsyncpa [#allocation9], 0 }
   0x4   :  { %17 = vsyncpa [#allocation4], 0 }
   0x5   :  { %19 = vsyncpa [#allocation4 + $0x1], 0  ;;  %s1509_s24 = smov 0   ;;  %s1511_s25 = smov 0  }
   0x6   :  { %s1513_s26 = smov 0   ;;  %s1515_s27 = smov 0  }
   0x7 LB: > { %s1530_s28 = sadd.s32 4294967295, %s1458_s27   ;;  %s972_s29 = sadd.s32 4294967294, %s1458_s27   ;;  %s1458_s27 = sphi %s1515_s27, %s1849_s27   ;;  %s1454_s26 = sphi %s1513_s26, %s1848_s26   ;;  %s1450_s25 = sphi %s1511_s25, %s1847_s25   ;;  %s1446_s24 = sphi %s1509_s24, %s1846_s24  }
   0x8   : > { %p45_p0 = scmp.ne.s32.totalorder %s1450_s25, %s1446_s24  ;;  %p1824_p1 = scmp.eq.s32.totalorder %s1530_s28, 0 }
   0x9   : > { %p201_p3 = scmp.eq.s32.totalorder %s972_s29, 1  ;;  %p973_p5 = scmp.ge.s32.totalorder %s1458_s27, 1 }
   0xa   : > { %p1539_p4 = por %p1824_p1, %p45_p0  ;;  %p208_p7 = scmp.lt.s32.totalorder %s1458_s27, 3 }
   0xb   : > { %p1544_p6 = por %p201_p3, %p45_p0  ;;  %s1460_s10 = smov [#allocation5]  }
   0xc   : > { %s1828_s30 = scalar_select %p1539_p4, 1, 0 }
   0xd   : > { %s1829_s8 = scalar_select %p1544_p6, 1, 0 }
   0xe   : > { %p1549_p8 = pnand %p973_p5, %p208_p7  ;;  %s220_s11 = sshll.u32 %s1460_s10, 4  ;;  %s1553_s11 = int_to_ptr.vmem [resolvable:$true] %s220_s11 }
   0xf   : > { %1830 = sst [smem:[#allocation15_spill]] %s1829_s8  ;;  %s1461_s13 = smov [#allocation7]  }
  0x10   : > { %s1831_s9 = scalar_select %p1549_p8, 1, 0 }
  0x11   : > { %p1162_p9 = pneg %p1549_p8  ;;  %s236_s14 = sshll.u32 %s1461_s13, 4  ;;  %s1564_s14 = int_to_ptr.vmem [resolvable:$true] %s236_s14 }
  0x12   : > { %s1462_s15 = smov [#allocation8]   ;;  %s1270_s19 = scalar_lea.hbm %s1817_s1, 3072 }
  0x13   : > { %p1560_p11 = pnand %p1162_p9, %p1824_p1  ;;  %s1566_s16 = sshll.u32 %s1462_s15, 4  ;;  %s253_s16 = int_to_ptr.vmem [resolvable:$true] %s1566_s16 }
  0x14   : > { %p1271_p12 = scmp.ne.s32.totalorder %s1817_s1, %s1270_s19  ;;  %p1277_p5 = scmp.lt.u32.totalorder %s1270_s19, %s1817_s1 }
  0x15   : > { %p1576_p13 = pneg %p1560_p11 }
  0x17   : > { %p1273_p0 = pnand %p1576_p13, %p1271_p12 }
  0x19   : > { %p1274_p3 = pneg %p1273_p0 }
  0x1b   : > { %p1279_p7 = pnand %p1277_p5, %p1274_p3 }
  0x1d   : > { %1282 = shalt.err (!%p1279_p7)
}
  0x1e   : > { %s1283_s10 = scalar_lea.vmem %s1553_s11, 3072  ;;  %p1291_p2 = scmp.lt.s32.totalorder %s1553_s11, %s1553_s11 }
  0x1f   : > { %p1284_p9 = scmp.ne.s32.totalorder %s1553_s11, %s1283_s10  ;;  %p1292_p6 = scmp.lt.s32.totalorder %s1283_s10, %s1283_s10 }
  0x21   : > { %p1286_p10 = pnand %p1284_p9, %p1576_p13  ;;  %p1293_p12 = por %p1292_p6, %p1291_p2 }
  0x23   : > { %p1287_p1 = pneg %p1286_p10 }
  0x25   : > { %p1294_p0 = pnand %p1293_p12, %p1287_p1 }
  0x27   : > { %1297 = shalt.err (!%p1294_p0)
}
  0x28   : > { %s1463_s13 = smov 64   ;;  %s1464_s15 = smov 4  }
  0x29   : > { %1165 = dma.hbm_to_vmem [thread:$0]  (!%p1560_p11), %s1817_s1, 3072, %s1553_s11, [#allocation6], %s1463_s13, %s1463_s13, %s1464_s15  }
  0x2a   : > { %s1298_s21 = scalar_lea.hbm %s1819_s3, 1024 }
  0x2b   : > { %p1299_p1 = scmp.ne.s32.totalorder %s1819_s3, %s1298_s21  ;;  %p1305_p10 = scmp.lt.u32.totalorder %s1298_s21, %s1819_s3 }
  0x2d   : > { %p1301_p2 = pnand %p1299_p1, %p1576_p13 }
  0x2f   : > { %p1302_p6 = pneg %p1301_p2 }
  0x31   : > { %p1307_p3 = pnand %p1305_p10, %p1302_p6 }
  0x33   : > { %1310 = shalt.err (!%p1307_p3)
}
  0x34   : > { %s1311_s11 = scalar_lea.vmem %s1564_s14, 1024  ;;  %p1319_p12 = scmp.lt.s32.totalorder %s1564_s14, %s1564_s14 }
  0x35   : > { %p1312_p5 = scmp.ne.s32.totalorder %s1564_s14, %s1311_s11  ;;  %p1320_p0 = scmp.lt.s32.totalorder %s1311_s11, %s1311_s11 }
  0x37   : > { %p1314_p7 = pnand %p1312_p5, %p1576_p13  ;;  %p1321_p1 = por %p1320_p0, %p1319_p12 }
  0x39   : > { %p1315_p9 = pneg %p1314_p7 }
  0x3b   : > { %p1322_p2 = pnand %p1321_p1, %p1315_p9 }
  0x3d   : > { %1325 = shalt.err (!%p1322_p2)
}
  0x3e   : > { %1168 = dma.hbm_to_vmem [thread:$0]  (!%p1560_p11), %s1819_s3, 1024, %s1564_s14, [#allocation6], %s1463_s13, %s1463_s13, %s1464_s15  }
  0x3f   : > { %s1326_s20 = scalar_lea.hbm %s1821_s5, 1024 }
  0x40   : > { %p1327_p6 = scmp.ne.s32.totalorder %s1821_s5, %s1326_s20  ;;  %p1333_p5 = scmp.lt.u32.totalorder %s1326_s20, %s1821_s5 }
  0x42   : > { %p1329_p10 = pnand %p1327_p6, %p1576_p13 }
  0x44   : > { %p1330_p3 = pneg %p1329_p10 }
  0x46   : > { %p1335_p7 = pnand %p1333_p5, %p1330_p3 }
  0x48   : > { %1338 = shalt.err (!%p1335_p7)
}
  0x49   : > { %s1339_s11 = scalar_lea.vmem %s253_s16, 1024  ;;  %p1347_p1 = scmp.lt.s32.totalorder %s253_s16, %s253_s16 }
  0x4a   : > { %p1340_p9 = scmp.ne.s32.totalorder %s253_s16, %s1339_s11  ;;  %p1348_p2 = scmp.lt.s32.totalorder %s1339_s11, %s1339_s11 }
  0x4c   : > { %p1342_p12 = pnand %p1340_p9, %p1576_p13  ;;  %p1349_p4 = por %p1348_p2, %p1347_p1 }
  0x4e   : > { %p1343_p0 = pneg %p1342_p12 }
  0x50   : > { %p1350_p8 = pnand %p1349_p4, %p1343_p0 }
  0x52   : > { %1353 = shalt.err (!%p1350_p8)
}
  0x53   : > { %1171 = dma.hbm_to_vmem [thread:$0]  (!%p1560_p11), %s1821_s5, 1024, %s253_s16, [#allocation9], %s1463_s13, %s1463_s13, %s1464_s15  }
  0x54   : > { %s1649_s22 = sadd.s32 1, %s1458_s27   ;;  %s32_s17 = sadd.s32 1, %s1454_s26 }
  0x55   : > { %s29_s12 = ssub.s32 %s1458_s27, %s1649_s22  ;;  %p39_p8 = scmp.ne.s32.totalorder %s1454_s26, %s1450_s25 }
  0x56   : > { %p30_p4 = scmp.eq.s32.totalorder %s29_s12, 0  ;;  %p40_p13 = scmp.eq.s32.totalorder %s1458_s27, 0 }
  0x57   : > { %p1183_p6 = scmp.lt.s32.totalorder %s1458_s27, 2  ;;  %p1834_p3 = scmp.eq.s32.totalorder %s1530_s28, 1 }
  0x58   : > { %s1659_s18 = scalar_select %p30_p4, %s1454_s26, %s32_s17  }
  0x59   : > { %p41_p10 = por %p40_p13, %p39_p8  ;;  %p1663_p5 = por %p1834_p3, %p39_p8 }
  0x5a   : > { %s269_s20 = sand.u32 1, %s1454_s26   ;;  %s1144_s21 = smul.u32 192, %s1458_s27 }
  0x5b   : > { %s1143_s16 = smul.u32 12, %s269_s20  ;;  %p1669_p11 = pnand %p1183_p6, %p41_p10 }
  0x5c   : > { %s1676_s29 = scalar_lea.hbm %s1816_s0, %s1144_s21  ;;  %s270_s14 = scalar_lea.sflag [#allocation3], %s269_s20 }
  0x5d   : > { %s273_s10 = scalar_lea.vmem [#allocation2], %s1143_s16  ;;  %s1354_s8 = scalar_lea.hbm %s1676_s29, 192 }
  0x5e   : > { %s281_s11 = sshll.u32 %s273_s10, 4  ;;  %p1355_p7 = scmp.ne.s32.totalorder %s1676_s29, %s1354_s8  ;;  %s1678_s11 = int_to_ptr.vmem [resolvable:$true] %s281_s11 }
  0x5f   : > { %p1356_p9 = pneg %p1669_p11  ;;  %s1359_s21 = scalar_lea.hbm %s1816_s0, 384 }
  0x60   : > { %p1360_p1 = scmp.lt.u32.totalorder %s1676_s29, %s1816_s0  ;;  %p1361_p2 = scmp.lt.u32.totalorder %s1359_s21, %s1354_s8 }
  0x61   : > { %p1357_p12 = pnand %p1356_p9, %p1355_p7  ;;  %p1363_p8 = scmp.lt.u32.totalorder %s1354_s8, %s1676_s29 }
  0x62   : > { %p1362_p4 = por %p1361_p2, %p1360_p1 }
  0x63   : > { %p1358_p0 = pneg %p1357_p12 }
  0x64   : > { %p1364_p13 = por %p1363_p8, %p1362_p4 }
  0x66   : > { %p1365_p6 = pnand %p1364_p13, %p1358_p0 }
  0x68   : > { %1368 = shalt.err (!%p1365_p6)
}
  0x69   : > { %s1369_s20 = scalar_lea.vmem %s1678_s11, 192  ;;  %s1465_s16 = smov [#allocation2]  }
  0x6a   : > { %p1370_p10 = scmp.ne.s32.totalorder %s1678_s11, %s1369_s20  ;;  %s1374_s10 = sshll.u32 %s1465_s16, 4  ;;  %s1375_s10 = int_to_ptr.vmem [resolvable:$false] %s1374_s10 }
  0x6b   : > { %s1376_s12 = scalar_lea.vmem %s1375_s10, 384  ;;  %p1377_p12 = scmp.lt.s32.totalorder %s1678_s11, %s1375_s10 }
  0x6c   : > { %p1372_p3 = pnand %p1370_p10, %p1356_p9  ;;  %p1378_p1 = scmp.lt.s32.totalorder %s1376_s12, %s1369_s20 }
  0x6e   : > { %p1373_p7 = pneg %p1372_p3  ;;  %p1379_p2 = por %p1378_p1, %p1377_p12 }
  0x70   : > { %p1380_p4 = pnand %p1379_p2, %p1373_p7 }
  0x72   : > { %1383 = shalt.err (!%p1380_p4)
}
  0x73   : > { %1175 = dma.hbm_to_vmem [thread:$0]  (!%p1669_p11), %s1676_s29, 192, %s1678_s11, %s270_s14  }
  0x74   : > { %p1837_p0 = scmp.ne.s32.totalorder %s1831_s9, 0 }
  0x75   : > { %s1708_s8 = sand.u32 (!%p1837_p0), 1, %s1450_s25   ;;  %p1838_p9 = scmp.ne.s32.totalorder (!%p1837_p0), %s1828_s30, 0 }
  0x76   : > { %290 = sbr.rel (%p1837_p0) target bundleno = 836 (0x344), region = 48  ;;  %s293_s21 = scalar_lea.sflag (!%p1837_p0), [#allocation3], %s1708_s8 }
  0x77   : > { %s1145_s17 = smul.u32 (!%p1837_p0), 12, %s1708_s8 }
  0x79   : > { %s1712_s15 = scalar_lea.vmem (!%p1837_p0), [#allocation2], %s1145_s17 }
  0x7d   : > { %1429 = dma.done.wait (%p1838_p9), %s293_s21, 192  }
  0x7e   : > { %1431 = vsyncadd (%p1838_p9), %s293_s21, 4294967104  ;;  %p1839_p11 = scmp.eq.s32.totalorder %s1530_s28, 0 }
  0x80   : > { %1433 = dma.done.wait (%p1839_p11), [#allocation6], 4096   ;;  %p1840_p8 = pmov %p1839_p11 }
  0x82   : > { %1435 = vsyncadd (%p1840_p8), [#allocation6], 4294963200  ;;  %p1841_p13 = pmov %p1840_p8 }
  0x83   : > { %p1842_p6 = pmov %p1840_p8 }
  0x84   : > { %1437 = dma.done.wait (%p1841_p13), [#allocation9], 1024  }
  0x85   : > { %1439 = vsyncadd (%p1842_p6), [#allocation9], 4294966272  ;;  %v1466_v0 = vmov 0.0   ;;  %vm1467_vm0 = vmmov 0   ;;  %v1227_v1 = vld [vmem:[#allocation5 + $0x40] sm:$0xff]   ;;  %v1230_v4 = vld [vmem:[#allocation5 + $0x48] sm:$0xff]  }
  0x86   : > { %1083 = vmatprep.subr.bf16.mxu1 %v1466_v0  ;;  %1099 = vmatprep.mubr.msk.bf16.mxu1 %vm1467_vm0, %v1466_v0  ;;  %v1228_v2 = vld [vmem:[#allocation5] sm:$0xff]   ;;  %v1231_v5 = vld [vmem:[#allocation5 + $0x8] sm:$0xff]   ;;  %v1233_v7 = vld [vmem:[#allocation5 + $0x50] sm:$0xff]   ;;  %s983_s11 = sshll.u32 %s1708_s8, 3  ;;  %s1031_s20 = sshll.u32 %s1530_s28, 7 }
  0x87   : > { %1034 = vmatprep.subr.bf16.mxu0 %v1227_v1  ;;  %v1229_v3 = vld [vmem:[#allocation5 + $0x80] sm:$0xff]   ;;  %v1232_v6 = vld [vmem:[#allocation5 + $0x88] sm:$0xff]   ;;  %v1234_v8 = vld [vmem:[#allocation5 + $0x10] sm:$0xff]   ;;  %s338_s16 = scalar_lea.vmem [#allocation10], %s983_s11  ;;  %s1772_s21 = scalar_lea.hbm %s1823_s7, %s1031_s20 }
  0x88   : > { %1035 = vmatpush3.bf16.msra.mxu0 %v1228_v2  ;;  %1084 = vmatpush3.bf16.msra.mxu1 %v1229_v3  ;;  %v1235_v9 = vld [vmem:[#allocation5 + $0x90] sm:$0xff]   ;;  %v1236_v10 = vld [vmem:[#allocation5 + $0x58] sm:$0xff]   ;;  %v1239_v13 = vld [vmem:[#allocation5 + $0x60] sm:$0xff]   ;;  %s873_s10 = sshll.u32 %s338_s16, 4  ;;  %s1468_s30 = smov [#allocation10]   ;;  %s1774_s10 = int_to_ptr.vmem [resolvable:$true] %s873_s10 }
  0x89   : > { %1036 = vmatprep.subr.bf16.mxu0 %v1230_v4  ;;  %1085 = vmatprep.subr.bf16.mxu1 %v1466_v0  ;;  %v1237_v11 = vld [vmem:[#allocation5 + $0x18] sm:$0xff]   ;;  %v1240_v14 = vld [vmem:[#allocation5 + $0x20] sm:$0xff]   ;;  %v1242_v16 = vld [vmem:[#allocation5 + $0x68] sm:$0xff]   ;;  %s1384_s28 = scalar_lea.vmem %s1774_s10, 128  ;;  %s1388_s9 = sshll.u32 %s1468_s30, 4  ;;  %s1389_s9 = int_to_ptr.vmem [resolvable:$false] %s1388_s9 }
  0x8a   : > { %v1238_v12 = vld [vmem:[#allocation5 + $0x98] sm:$0xff]   ;;  %v1241_v15 = vld [vmem:[#allocation5 + $0xa0] sm:$0xff]   ;;  %v1243_v17 = vld [vmem:[#allocation5 + $0x28] sm:$0xff]   ;;  %p1385_p10 = scmp.ne.s32.totalorder %s1774_s10, %s1384_s28  ;;  %s1390_s13 = scalar_lea.vmem %s1389_s9, 256 }
  0x8b   : > { %v1244_v18 = vld [vmem:[#allocation5 + $0xa8] sm:$0xff]   ;;  %v1245_v19 = vld [vmem:[#allocation5 + $0x70] sm:$0xff]   ;;  %v1248_v23 = vld [vmem:[#allocation5 + $0x78] sm:$0xff]   ;;  %p1391_p12 = scmp.lt.s32.totalorder %s1774_s10, %s1389_s9  ;;  %p1392_p1 = scmp.lt.s32.totalorder %s1390_s13, %s1384_s28 }
  0x8c   : > { %1037 = vmatpush3.bf16.msra.mxu0 %v1231_v5  ;;  %1086 = vmatpush3.bf16.msra.mxu1 %v1232_v6  ;;  %v1246_v20 = vld [vmem:[#allocation5 + $0x30] sm:$0xff]   ;;  %v1249_v25 = vld [vmem:[#allocation5 + $0x38] sm:$0xff]   ;;  %v1254_v28 = vld [vmem:[#allocation7] sm:$0xff]   ;;  %p1386_p3 = pnand %p1385_p10, %p1663_p5 }
  0x8d   : > { %1038 = vmatprep.subr.bf16.mxu0 %v1233_v7  ;;  %1087 = vmatprep.subr.bf16.mxu1 %v1466_v0  ;;  %v340_v21 = vld [vmem:[%s1712_s15] sm:$0xff]  ;;  %v1253_v27 = vld [vmem:[%s1712_s15 + $0x8] ss:$0 sps:$4 sm:$0xff]   ;;  %v1258_v33 = vld [vmem:[#allocation7 + $0x20] sm:$0xff]   ;;  %s860_s15 = scalar_lea.sflag [#allocation4], %s1708_s8  ;;  %p1393_p2 = por %p1392_p1, %p1391_p12 }
  0x8e   : > { %v1247_v22 = vld [vmem:[#allocation5 + $0xb0] sm:$0xff]   ;;  %v986_v24 = vcombine.high %v340_v21, %v340_v21  ;;  %v1252_v26 = vld [vmem:[#allocation5 + $0xb8] sm:$0xff]   ;;  %v985_v29 = vcombine.low %v340_v21, %v340_v21  ;;  %v1255_v30 = vld [vmem:[#allocation7 + $0x8] sm:$0xff]   ;;  %p1387_p7 = pneg %p1386_p3 }
  0x8f   : > { %v1256_v31 = vld [vmem:[#allocation7 + $0x10] sm:$0xff]   ;;  %v1257_v32 = vld [vmem:[#allocation7 + $0x18] sm:$0xff]   ;;  %v1259_v34 = vld [vmem:[#allocation7 + $0x28] sm:$0xff]  }
  0x90   : > { %1039 = vmatpush3.bf16.msra.mxu0 %v1234_v8  ;;  %1088 = vmatpush3.bf16.msra.mxu1 %v1235_v9  ;;  %v1260_v35 = vld [vmem:[#allocation7 + $0x30] sm:$0xff]   ;;  %v1261_v36 = vld [vmem:[#allocation7 + $0x38] sm:$0xff]   ;;  %v1262_v37 = vld [vmem:[#allocation8] sm:$0xff]   ;;  %p1394_p4 = pnand %p1393_p2, %p1387_p7 }
  0x91   : > { %1040 = vmatprep.subr.bf16.mxu0 %v1236_v10  ;;  %1089 = vmatprep.subr.bf16.mxu1 %v1466_v0  ;;  %v1263_v38 = vld [vmem:[#allocation8 + $0x8] sm:$0xff]   ;;  %v1264_v39 = vld [vmem:[#allocation8 + $0x10] sm:$0xff]   ;;  %v1265_v40 = vld [vmem:[#allocation8 + $0x18] sm:$0xff]  }
  0x92   : > { %584 = vmatprep.mubr.bf16.mxu0 %v986_v24  ;;  %v1266_v41 = vld [vmem:[#allocation8 + $0x20] sm:$0xff]   ;;  %v1267_v42 = vld [vmem:[#allocation8 + $0x28] sm:$0xff]   ;;  %v1268_v57 = vld [vmem:[#allocation8 + $0x30] sm:$0xff]  }
  0x93   : > { %v984_v45 = vld [vmem:[%s1818_s2] ss:$0 sm:$0xff]  ;;  %v1269_v58 = vld [vmem:[#allocation8 + $0x38] sm:$0xff]  }
  0x94   : > { %1041 = vmatpush3.bf16.msra.mxu0 %v1237_v11  ;;  %1090 = vmatpush3.bf16.msra.mxu1 %v1238_v12  ;;  %v1012_v59 = vld [vmem:[%s1820_s4] ss:$0 sm:$0xff] }
  0x95   : > { %1042 = vmatprep.subr.bf16.mxu0 %v1239_v13  ;;  %1091 = vmatprep.subr.bf16.mxu1 %v1466_v0 }
  0x98   : > { %1043 = vmatpush3.bf16.msra.mxu0 %v1240_v14  ;;  %1092 = vmatpush3.bf16.msra.mxu1 %v1241_v15 }
  0x99   : > { %1044 = vmatprep.subr.bf16.mxu0 %v1242_v16  ;;  %1093 = vmatprep.subr.bf16.mxu1 %v1466_v0 }
  0x9c   : > { %1045 = vmatpush3.bf16.msra.mxu0 %v1243_v17  ;;  %1094 = vmatpush3.bf16.msra.mxu1 %v1244_v18 }
  0x9d   : > { %1046 = vmatprep.subr.bf16.mxu0 %v1245_v19  ;;  %1095 = vmatprep.subr.bf16.mxu1 %v1466_v0 }
  0xa0   : > { %1047 = vmatpush3.bf16.msra.mxu0 %v1246_v20  ;;  %1096 = vmatpush3.bf16.msra.mxu1 %v1247_v22 }
  0xa1   : > { %1048 = vmatprep.subr.bf16.mxu0 %v1248_v23  ;;  %1097 = vmatprep.subr.bf16.mxu1 %v1466_v0 }
  0xa4   : > { %1049 = vmatpush3.bf16.msra.mxu0 %v1249_v25  ;;  %1098 = vmatpush3.bf16.msra.mxu1 %v1252_v26 }
  0xa5   : > { %1103 = vmatprep.subr.bf16.mxu0 %v1466_v0  ;;  %1123 = vmatprep.subr.bf16.mxu1 %v1466_v0 }
  0xa7   : > { %585 = vmatmul.mubr.bf16.vlgmr.msra.gmra.mrb[0].mxu0 %v985_v29  ;;  %1100 = vmatmul.mubr.bf16.vlgmr.msra.gmra.mrb[0].mxu1 %v1253_v27 }
  0xa8   : > { %1104 = vmatpush3.bf16.msra.mxu0 %v1254_v28  ;;  %1119 = vmatprep.mubr.msk.bf16.mxu0 %vm1467_vm0, %v1466_v0 }
  0xa9   : > { %1105 = vmatprep.subr.bf16.mxu0 %v1466_v0  ;;  %1139 = vmatprep.mubr.msk.bf16.mxu1 %vm1467_vm0, %v1466_v0 }
  0xaa   : > { %1124 = vmatpush3.bf16.msra.mxu1 %v1262_v37 }
  0xab   : > { %1125 = vmatprep.subr.bf16.mxu1 %v1466_v0 }
  0xac   : > { %1106 = vmatpush3.bf16.msra.mxu0 %v1255_v30 }
  0xad   : > { %1107 = vmatprep.subr.bf16.mxu0 %v1466_v0 }
  0xae   : > { %1126 = vmatpush3.bf16.msra.mxu1 %v1263_v38 }
  0xaf   : > { %1127 = vmatprep.subr.bf16.mxu1 %v1466_v0 }
  0xb0   : > { %1108 = vmatpush3.bf16.msra.mxu0 %v1256_v31 }
  0xb1   : > { %1109 = vmatprep.subr.bf16.mxu0 %v1466_v0 }
  0xb2   : > { %1128 = vmatpush3.bf16.msra.mxu1 %v1264_v39 }
  0xb3   : > { %1129 = vmatprep.subr.bf16.mxu1 %v1466_v0 }
  0xb4   : > { %1110 = vmatpush3.bf16.msra.mxu0 %v1257_v32 }
  0xb5   : > { %1111 = vmatprep.subr.bf16.mxu0 %v1466_v0 }
  0xb6   : > { %1130 = vmatpush3.bf16.msra.mxu1 %v1265_v40 }
  0xb7   : > { %1131 = vmatprep.subr.bf16.mxu1 %v1466_v0 }
  0xb8   : > { %1112 = vmatpush3.bf16.msra.mxu0 %v1258_v33 }
  0xb9   : > { %1113 = vmatprep.subr.bf16.mxu0 %v1466_v0 }
  0xba   : > { %1132 = vmatpush3.bf16.msra.mxu1 %v1266_v41 }
  0xbb   : > { %1133 = vmatprep.subr.bf16.mxu1 %v1466_v0 }
  0xbc   : > { %1114 = vmatpush3.bf16.msra.mxu0 %v1259_v34 }
  0xbd   : > { %1115 = vmatprep.subr.bf16.mxu0 %v1466_v0 }
  0xbe   : > { %1134 = vmatpush3.bf16.msra.mxu1 %v1267_v42 }
  0xbf   : > { %1135 = vmatprep.subr.bf16.mxu1 %v1466_v0 }
  0xc0   : > { %1116 = vmatpush3.bf16.msra.mxu0 %v1260_v35 }
  0xc1   : > { %1117 = vmatprep.subr.bf16.mxu0 %v1466_v0 }
  0xc2   : > { %1136 = vmatpush3.bf16.msra.mxu1 %v1268_v57 }
  0xc3   : > { %1137 = vmatprep.subr.bf16.mxu1 %v1466_v0  ;;  %v1021_v0 = vld [vmem:[%s1822_s6] ss:$0 sm:$0xff] }
  0xc4   : > { %1118 = vmatpush3.bf16.msra.mxu0 %v1261_v36 }
  0xc6   : > { %1138 = vmatpush3.bf16.msra.mxu1 %v1269_v58 }
 0x17a   : > { %v1050_v43 = vpop.f32.mrb[0].mxu0  ;;  %v626_v46 = vpop.f32.mrb[0].mxu1 }
 0x17b   : > { %v1051_v44 = vpop.f32.mrb[1].mxu0  ;;  %v1101_v49 = vpop.f32.mrb[1].mxu1 }
 0x17c   : > { %v1052_v47 = vadd.f32 %v1051_v44, %v1050_v43  ;;  %v1053_v48 = vpop.f32.mrb[2].mxu0  ;;  %v629_v51 = vpop.f32.mrb[2].mxu1 }
 0x17d   : > { %v1054_v50 = vpop.f32.mrb[3].mxu0  ;;  %v1102_v53 = vpop.f32.mrb[3].mxu1 }
 0x17e   : > { %v587_v52 = vadd.f32 %v1052_v47, %v984_v45 }
 0x180   : > { %v627_v54 = vadd.f32 %v626_v46, %v587_v52 }
 0x182   : > { %v632_v55 = vmax.f32 %v627_v54, 0.0 }
 0x184   : > { %v633_v56 = vpack.c.bf16 %v632_v55, %v632_v55 }
 0x186   : > { %1120 = vmatmul.mubr.bf16.vlgmr.msra.gmra.mrb[4].mxu0 %v633_v56 }
 0x259   : > { %v739_v60 = vpop.f32.mrb[4].mxu0 }
 0x25a   : > { %v740_v61 = vadd.f32 %v1012_v59, %v739_v60  ;;  %v1121_v62 = vpop.f32.mrb[5].mxu0 }
 0x25b   : > { %v742_v63 = vpop.f32.mrb[6].mxu0 }
 0x25c   : > { %v745_v1 = vmax.f32 %v740_v61, 0.0  ;;  %v1122_v2 = vpop.f32.mrb[7].mxu0 }
 0x25e   : > { %v746_v3 = vpack.c.bf16 %v745_v1, %v745_v1 }
 0x260   : > { %1140 = vmatmul.mubr.bf16.vlgmr.msra.gmra.mrb[4].mxu1 %v746_v3 }
 0x333   : > { %v852_v4 = vpop.f32.mrb[4].mxu1 }
 0x334   : > { %v853_v5 = vadd.f32 %v1021_v0, %v852_v4  ;;  %v1141_v6 = vpop.f32.mrb[5].mxu1 }
 0x335   : > { %v855_v7 = vpop.f32.mrb[6].mxu1 }
 0x336   : > { %858 = vst [vmem:[%s338_s16] sm:$0xff] %v853_v5  ;;  %v1142_v8 = vpop.f32.mrb[7].mxu1 }
 0x337   : > { %1397 = shalt.err (!%p1394_p4)
}
 0x338   : > { %s1398_s8 = scalar_lea.hbm %s1772_s21, 128  ;;  %s1402_s14 = scalar_lea.hbm %s1823_s7, 256 }
 0x339   : > { %p1399_p0 = scmp.ne.s32.totalorder %s1772_s21, %s1398_s8  ;;  %p1403_p8 = scmp.lt.u32.totalorder %s1772_s21, %s1823_s7 }
 0x33a   : > { %p1404_p13 = scmp.lt.u32.totalorder %s1402_s14, %s1398_s8  ;;  %p1406_p10 = scmp.lt.u32.totalorder %s1398_s8, %s1772_s21 }
 0x33b   : > { %p1400_p9 = pnand %p1399_p0, %p1663_p5 }
 0x33c   : > { %p1405_p6 = por %p1404_p13, %p1403_p8 }
 0x33d   : > { %p1401_p11 = pneg %p1400_p9 }
 0x33e   : > { %p1407_p3 = por %p1406_p10, %p1405_p6 }
 0x340   : > { %p1408_p7 = pnand %p1407_p3, %p1401_p11 }
 0x342   : > { %1411 = shalt.err (!%p1408_p7)
}
 0x343   : > { %1160 = dma.vmem_to_hbm [thread:$0]  (%p1663_p5), %s1774_s10, 128, %s1772_s21, %s860_s15  }
 0x344 PF: > { %s1843_s16 = sld [smem:[#allocation15_spill]]  ;;  %s885_s12 = sand.u32 1, %s1446_s24  }
 0x345   : > { %p1845_p1 = scmp.ge.s32.totalorder %s1458_s27, 2  ;;  %s886_s17 = scalar_lea.sflag [#allocation4], %s885_s12 }
 0x34a   : > { %p1844_p12 = scmp.ne.s32.totalorder %s1843_s16, 0 }
 0x34c   : > { %p1177_p2 = pnand %p1845_p1, %p1844_p12 }
 0x34e   : > { %1441 = dma.done.wait (!%p1177_p2), %s886_s17, 128  }
 0x34f   : > { %1443 = vsyncadd (!%p1177_p2), %s886_s17, 4294967168  ;;  %p22_p4 = scmp.ge.s32.totalorder %s1649_s22, 4   ;;  %s1846_s24 = smov %s1450_s25 }
 0x350   : > { %s1847_s25 = smov %s1454_s26  ;;  %s1848_s26 = smov %s1659_s18 }
 0x351   : > { %s1849_s27 = smov %s1649_s22  ;;  %24 = sbr.rel (!%p22_p4) target bundleno = 7 (0x7), region = 105 }
 0x358   :  { %891 = vsyncpa [#allocation3], 1 }
 0x359   :  { %893 = vsyncpa [#allocation3 + $0x1], 1 }
 0x35a   :  { %894 = vsyncpa [#allocation6], 1 }
 0x35b   :  { %895 = vsyncpa [#allocation9], 1 }
 0x35c   :  { %896 = vsyncpa [#allocation4], 1 }
 0x35d   :  { %898 = vsyncpa [#allocation4 + $0x1], 1 }

</bundles_post_ra>
